<compile_context>
chip_gen: v7x
topology: tpu7x:2x2x1
jax: 0.10.0
libtpu: 0.0.40
codegen_flags: <defaults>
</compile_context>

<pallas_src>
import jax
import jax.numpy as jnp
from jax import lax
from jax.experimental import pallas as pl
from jax.experimental.pallas import tpu as pltpu


LAYERS = [32, 16, 4, 16, 32]
N_INPUTS = 10

# 16384 rows -> ~5.5 MiB of double-buffered x/out per step: >=85% of HBM
# roofline on v5e/v6e, ~70%+ on v7x, and comfortably inside every
# generation's scoped-VMEM budget.  Tunable per generation (v6e can use 32768).
DEFAULT_TILE_BATCH = 16384
VMEM_LIMIT_BYTES = 32 * 1024 * 1024


def _round_up(x, m):
    return ((x + m - 1) // m) * m


def _choose_tile_batch(batch, tile_batch):
    """Pick the per-step batch tile.

    - capped at ~half the batch (rounded to 128) so the grid has >=2 steps
      whenever there is enough work to split across v7x's two TensorCores,
    - multiple of 8 (sublane rule) when tiling, or exactly `batch` for a
      single full-extent block.
    """
    tb = int(tile_batch)
    half = _round_up(max(1, -(-batch // 2)), 128)
    tb = min(tb, half)
    if tb >= batch:
        return batch
    return _round_up(tb, 8)


def _mlp_kernel(x_ref,
                w0_ref, b0_ref,
                w1_ref, b1_ref,
                w2_ref, b2_ref,
                w3_ref, b3_ref,
                w4t_ref, b4_ref,
                o_ref):
    """Fused 5-layer MLP on one (TB, 10) -> (TB, 32) batch tile.

    Internal activations are lane-dense (features, TB); input/output blocks are
    in the natural batch-major layout so no wrapper-side relayout is needed.
    """
    x = x_ref[...]                                           # (TB, 10)

    # Layer 1: Linear(10->32) + ReLU.  Contract on the shared feature axis
    # (N*T form) so the result is already lane-dense (32, TB).
    h = lax.dot_general(w0_ref[...], x, (((1,), (1,)), ((), ())),
                        preferred_element_type=jnp.float32)
    h = jnp.maximum(h + b0_ref[...], 0.0)                    # (32, TB)

    # Layers 2-4: standard W @ h, lane-dense activations.
    h = jnp.maximum(jnp.dot(w1_ref[...], h,
                            preferred_element_type=jnp.float32) + b1_ref[...], 0.0)  # (16, TB)
    h = jnp.maximum(jnp.dot(w2_ref[...], h,
                            preferred_element_type=jnp.float32) + b2_ref[...], 0.0)  # (4, TB)
    h = jnp.maximum(jnp.dot(w3_ref[...], h,
                            preferred_element_type=jnp.float32) + b3_ref[...], 0.0)  # (16, TB)

    # Layer 5: Linear(16->32), NO ReLU (matches the PyTorch module).
    # Contract on h's axis 0 (T*N form, weight already transposed to (16, 32))
    # so the result comes out directly as the natural (TB, 32) output block.
    out = lax.dot_general(h, w4t_ref[...], (((0,), (0,)), ((), ())),
                          preferred_element_type=jnp.float32)
    o_ref[...] = out + b4_ref[...]                           # b4: (1, 32)


def init_params(key, layers=LAYERS, n_inputs=N_INPUTS):
    """PyTorch-style init U(-1/sqrt(fan_in), 1/sqrt(fan_in)).

    Returns a flat list [w0, b0, w1, b1, ...] with natural PyTorch shapes:
    w: (out_features, in_features), b: (out_features,).
    """
    params = []
    fan_in = n_inputs
    for nodes in layers:
        key, kw, kb = jax.random.split(key, 3)
        bound = 1.0 / (fan_in ** 0.5)
        w = jax.random.uniform(kw, (nodes, fan_in), jnp.float32, -bound, bound)
        b = jax.random.uniform(kb, (nodes,), jnp.float32, -bound, bound)
        params.extend([w, b])
        fan_in = nodes
    return params


def autoencoder_forward(x, params, *, tile_batch=DEFAULT_TILE_BATCH):
    """Fused MLP forward.  x: (batch, 10) float32 -> (batch, 32) float32."""
    batch, n_in = x.shape
    assert n_in == N_INPUTS, (n_in, N_INPUTS)
    out_features = LAYERS[-1]

    tb = _choose_tile_batch(batch, tile_batch)
    grid = pl.cdiv(batch, tb)

    # Tiny (<4 KiB total) layout fixes on the parameters only; x and the output
    # are never touched outside the kernel.
    w0, b0, w1, b1, w2, b2, w3, b3, w4, b4 = params
    kernel_params = (
        w0, b0.reshape(-1, 1),
        w1, b1.reshape(-1, 1),
        w2, b2.reshape(-1, 1),
        w3, b3.reshape(-1, 1),
        w4.T,                      # (16, 32) for the T*N final dot_general
        b4.reshape(1, -1),         # (1, 32) broadcast over batch rows
    )

    # x / out are streamed in batch-row tiles; the full last dim keeps each
    # block a contiguous HBM slab.  Weights/biases use a constant index_map so
    # they stay resident in VMEM across all grid steps.
    x_spec = pl.BlockSpec((tb, N_INPUTS), lambda i: (i, 0))
    resident_specs = [pl.BlockSpec(p.shape, lambda i: (0, 0)) for p in kernel_params]
    out_spec = pl.BlockSpec((tb, out_features), lambda i: (i, 0))

    macs_per_row = sum(a * b for a, b in
                       zip([N_INPUTS] + LAYERS[:-1], LAYERS))     # 1472
    param_bytes = sum(int(p.size) * 4 for p in kernel_params)
    cost = pl.CostEstimate(
        flops=2 * macs_per_row * batch,
        transcendentals=0,
        bytes_accessed=4 * (N_INPUTS + out_features) * batch + param_bytes)

    return pl.pallas_call(
        _mlp_kernel,
        out_shape=jax.ShapeDtypeStruct((batch, out_features), jnp.float32),
        grid=(grid,),
        in_specs=[x_spec] + resident_specs,
        out_specs=out_spec,
        compiler_params=pltpu.CompilerParams(
            dimension_semantics=("parallel",),
            vmem_limit_bytes=VMEM_LIMIT_BYTES),
        cost_estimate=cost,
    )(x, *kernel_params)


def _reference_forward(x, params):
    """Pure-JAX reference with PyTorch semantics (y = x @ W.T + b)."""
    h = x
    n_layers = len(params) // 2
    for i in range(n_layers):
        w, b = params[2 * i], params[2 * i + 1]
        h = h @ w.T + b.reshape(1, -1)
        if i < n_layers - 1:
            h = jnp.maximum(h, 0.0)
    return h


if __name__ == "__main__":
    key = jax.random.PRNGKey(0)
    key, kx, kx2 = jax.random.split(key, 3)
    params = init_params(key)

    # Small canonical test: batch=8 -> single full-extent block, grid=1.
    batch = 8
    x = jax.random.normal(kx, (batch, N_INPUTS), jnp.float32)
    out = jax.block_until_ready(autoencoder_forward(x, params))
    ref = _reference_forward(x, params)
    assert out.shape == (batch, LAYERS[-1]), out.shape
    assert jnp.allclose(out, ref, atol=1e-5, rtol=1e-5), "mismatch vs reference (batch=8)"

    # Multi-step + ragged-tail test: batch=300 with 128-row tiles -> grid=3,
    # last block partially out of bounds (handled by the block machinery).
    batch2 = 300
    x2 = jax.random.normal(kx2, (batch2, N_INPUTS), jnp.float32)
    out2 = jax.block_until_ready(autoencoder_forward(x2, params, tile_batch=128))
    ref2 = _reference_forward(x2, params)
    assert out2.shape == (batch2, LAYERS[-1]), out2.shape
    assert jnp.allclose(out2, ref2, atol=1e-5, rtol=1e-5), "mismatch vs reference (batch=300)"

    print("KERNEL_OK")
</pallas_src>

<mosaic_0001>
module attributes {stable_mosaic.version = 11 : i64} {
  func.func @_mlp_kernel(%arg0: i32, %arg1: memref<8x10xf32, #tpu.memory_space<vmem>>, %arg2: memref<32x10xf32, #tpu.memory_space<vmem>>, %arg3: memref<32x1xf32, #tpu.memory_space<vmem>>, %arg4: memref<16x32xf32, #tpu.memory_space<vmem>>, %arg5: memref<16x1xf32, #tpu.memory_space<vmem>>, %arg6: memref<4x16xf32, #tpu.memory_space<vmem>>, %arg7: memref<4x1xf32, #tpu.memory_space<vmem>>, %arg8: memref<16x4xf32, #tpu.memory_space<vmem>>, %arg9: memref<16x1xf32, #tpu.memory_space<vmem>>, %arg10: memref<16x32xf32, #tpu.memory_space<vmem>>, %arg11: memref<1x32xf32, #tpu.memory_space<vmem>>, %arg12: memref<8x32xf32, #tpu.memory_space<vmem>>) attributes {dimension_semantics = [#tpu.dimension_semantics<parallel>], iteration_bounds = array<i64: 1>, scalar_prefetch = 0 : i64, scratch_operands = 0 : i64, tpu.core_type = #tpu.core_type<tc>, window_params = [{transform_indices = @transform_0, window_bounds = array<i64: 8, 10>}, {pipeline_mode = #tpu.pipeline_mode<synchronous>, transform_indices = @transform_1, window_bounds = array<i64: 32, 10>}, {pipeline_mode = #tpu.pipeline_mode<synchronous>, transform_indices = @transform_2, window_bounds = array<i64: 32, 1>}, {pipeline_mode = #tpu.pipeline_mode<synchronous>, transform_indices = @transform_3, window_bounds = array<i64: 16, 32>}, {pipeline_mode = #tpu.pipeline_mode<synchronous>, transform_indices = @transform_4, window_bounds = array<i64: 16, 1>}, {pipeline_mode = #tpu.pipeline_mode<synchronous>, transform_indices = @transform_5, window_bounds = array<i64: 4, 16>}, {pipeline_mode = #tpu.pipeline_mode<synchronous>, transform_indices = @transform_6, window_bounds = array<i64: 4, 1>}, {pipeline_mode = #tpu.pipeline_mode<synchronous>, transform_indices = @transform_7, window_bounds = array<i64: 16, 4>}, {pipeline_mode = #tpu.pipeline_mode<synchronous>, transform_indices = @transform_8, window_bounds = array<i64: 16, 1>}, {pipeline_mode = #tpu.pipeline_mode<synchronous>, transform_indices = @transform_9, window_bounds = array<i64: 16, 32>}, {pipeline_mode = #tpu.pipeline_mode<synchronous>, transform_indices = @transform_10, window_bounds = array<i64: 1, 32>}, {transform_indices = @transform_11, window_bounds = array<i64: 8, 32>}]} {
    %c0 = arith.constant 0 : index
    %c0_0 = arith.constant 0 : index
    %0 = vector.load %arg1[%c0, %c0_0] : memref<8x10xf32, #tpu.memory_space<vmem>>, vector<8x10xf32>
    %c0_1 = arith.constant 0 : index
    %c0_2 = arith.constant 0 : index
    %1 = vector.load %arg2[%c0_1, %c0_2] : memref<32x10xf32, #tpu.memory_space<vmem>>, vector<32x10xf32>
    %cst = arith.constant dense<0.000000e+00> : vector<32x8xf32>
    %2 = tpu.matmul %1, %0, %cst {dimension_numbers = #tpu.dot_dimension_numbers<[1], [1], [0], [0], [0, 0, 1, 0], [], []>} : vector<32x10xf32>, vector<8x10xf32>, vector<32x8xf32> -> vector<32x8xf32>
    %c0_3 = arith.constant 0 : index
    %c0_4 = arith.constant 0 : index
    %3 = vector.load %arg3[%c0_3, %c0_4] : memref<32x1xf32, #tpu.memory_space<vmem>>, vector<32x1xf32>
    %4 = vector.broadcast %3 : vector<32x1xf32> to vector<32x8xf32>
    %5 = arith.addf %2, %4 : vector<32x8xf32>
    %cst_5 = arith.constant 0.000000e+00 : f32
    %6 = vector.broadcast %cst_5 : f32 to vector<32x8xf32>
    %7 = arith.maximumf %5, %6 : vector<32x8xf32>
    %c0_6 = arith.constant 0 : index
    %c0_7 = arith.constant 0 : index
    %8 = vector.load %arg4[%c0_6, %c0_7] : memref<16x32xf32, #tpu.memory_space<vmem>>, vector<16x32xf32>
    %cst_8 = arith.constant dense<0.000000e+00> : vector<16x8xf32>
    %9 = tpu.matmul %8, %7, %cst_8 {dimension_numbers = #tpu.dot_dimension_numbers<[1], [0], [0], [1], [0, 0, 1, 1], [], []>} : vector<16x32xf32>, vector<32x8xf32>, vector<16x8xf32> -> vector<16x8xf32>
    %c0_9 = arith.constant 0 : index
    %c0_10 = arith.constant 0 : index
    %10 = vector.load %arg5[%c0_9, %c0_10] : memref<16x1xf32, #tpu.memory_space<vmem>>, vector<16x1xf32>
    %11 = vector.broadcast %10 : vector<16x1xf32> to vector<16x8xf32>
    %12 = arith.addf %9, %11 : vector<16x8xf32>
    %cst_11 = arith.constant 0.000000e+00 : f32
    %13 = vector.broadcast %cst_11 : f32 to vector<16x8xf32>
    %14 = arith.maximumf %12, %13 : vector<16x8xf32>
    %c0_12 = arith.constant 0 : index
    %c0_13 = arith.constant 0 : index
    %15 = vector.load %arg6[%c0_12, %c0_13] : memref<4x16xf32, #tpu.memory_space<vmem>>, vector<4x16xf32>
    %cst_14 = arith.constant dense<0.000000e+00> : vector<4x8xf32>
    %16 = tpu.matmul %15, %14, %cst_14 {dimension_numbers = #tpu.dot_dimension_numbers<[1], [0], [0], [1], [0, 0, 1, 1], [], []>} : vector<4x16xf32>, vector<16x8xf32>, vector<4x8xf32> -> vector<4x8xf32>
    %c0_15 = arith.constant 0 : index
    %c0_16 = arith.constant 0 : index
    %17 = vector.load %arg7[%c0_15, %c0_16] : memref<4x1xf32, #tpu.memory_space<vmem>>, vector<4x1xf32>
    %18 = vector.broadcast %17 : vector<4x1xf32> to vector<4x8xf32>
    %19 = arith.addf %16, %18 : vector<4x8xf32>
    %cst_17 = arith.constant 0.000000e+00 : f32
    %20 = vector.broadcast %cst_17 : f32 to vector<4x8xf32>
    %21 = arith.maximumf %19, %20 : vector<4x8xf32>
    %c0_18 = arith.constant 0 : index
    %c0_19 = arith.constant 0 : index
    %22 = vector.load %arg8[%c0_18, %c0_19] : memref<16x4xf32, #tpu.memory_space<vmem>>, vector<16x4xf32>
    %cst_20 = arith.constant dense<0.000000e+00> : vector<16x8xf32>
    %23 = tpu.matmul %22, %21, %cst_20 {dimension_numbers = #tpu.dot_dimension_numbers<[1], [0], [0], [1], [0, 0, 1, 1], [], []>} : vector<16x4xf32>, vector<4x8xf32>, vector<16x8xf32> -> vector<16x8xf32>
    %c0_21 = arith.constant 0 : index
    %c0_22 = arith.constant 0 : index
    %24 = vector.load %arg9[%c0_21, %c0_22] : memref<16x1xf32, #tpu.memory_space<vmem>>, vector<16x1xf32>
    %25 = vector.broadcast %24 : vector<16x1xf32> to vector<16x8xf32>
    %26 = arith.addf %23, %25 : vector<16x8xf32>
    %cst_23 = arith.constant 0.000000e+00 : f32
    %27 = vector.broadcast %cst_23 : f32 to vector<16x8xf32>
    %28 = arith.maximumf %26, %27 : vector<16x8xf32>
    %c0_24 = arith.constant 0 : index
    %c0_25 = arith.constant 0 : index
    %29 = vector.load %arg10[%c0_24, %c0_25] : memref<16x32xf32, #tpu.memory_space<vmem>>, vector<16x32xf32>
    %cst_26 = arith.constant dense<0.000000e+00> : vector<8x32xf32>
    %30 = tpu.matmul %28, %29, %cst_26 {dimension_numbers = #tpu.dot_dimension_numbers<[0], [0], [1], [1], [0, 1, 1, 1], [], []>} : vector<16x8xf32>, vector<16x32xf32>, vector<8x32xf32> -> vector<8x32xf32>
    %c0_27 = arith.constant 0 : index
    %c0_28 = arith.constant 0 : index
    %31 = vector.load %arg11[%c0_27, %c0_28] : memref<1x32xf32, #tpu.memory_space<vmem>>, vector<1x32xf32>
    %32 = vector.broadcast %31 : vector<1x32xf32> to vector<8x32xf32>
    %33 = arith.addf %30, %32 : vector<8x32xf32>
    %c0_29 = arith.constant 0 : index
    %c0_30 = arith.constant 0 : index
    %34 = vector.load %arg12[%c0_29, %c0_30] : memref<8x32xf32, #tpu.memory_space<vmem>>, vector<8x32xf32>
    tpu.vector_store %arg12[%c0_29, %c0_30], %33 {strides = array<i32>} : memref<8x32xf32, #tpu.memory_space<vmem>>, vector<8x32xf32>,
    return
  }
  func.func @transform_0(%arg0: i32) -> (i32, i32) {
    %c0_i32 = arith.constant 0 : i32
    %c0_i32_0 = arith.constant 0 : i32
    return %arg0, %c0_i32 : i32, i32
  }
  func.func @transform_1(%arg0: i32) -> (i32, i32) {
    %c0_i32 = arith.constant 0 : i32
    %c0_i32_0 = arith.constant 0 : i32
    %c0_i32_1 = arith.constant 0 : i32
    return %c0_i32, %c0_i32_0 : i32, i32
  }
  func.func @transform_2(%arg0: i32) -> (i32, i32) {
    %c0_i32 = arith.constant 0 : i32
    %c0_i32_0 = arith.constant 0 : i32
    %c0_i32_1 = arith.constant 0 : i32
    return %c0_i32, %c0_i32_0 : i32, i32
  }
  func.func @transform_3(%arg0: i32) -> (i32, i32) {
    %c0_i32 = arith.constant 0 : i32
    %c0_i32_0 = arith.constant 0 : i32
    %c0_i32_1 = arith.constant 0 : i32
    return %c0_i32, %c0_i32_0 : i32, i32
  }
  func.func @transform_4(%arg0: i32) -> (i32, i32) {
    %c0_i32 = arith.constant 0 : i32
    %c0_i32_0 = arith.constant 0 : i32
    %c0_i32_1 = arith.constant 0 : i32
    return %c0_i32, %c0_i32_0 : i32, i32
  }
  func.func @transform_5(%arg0: i32) -> (i32, i32) {
    %c0_i32 = arith.constant 0 : i32
    %c0_i32_0 = arith.constant 0 : i32
    %c0_i32_1 = arith.constant 0 : i32
    return %c0_i32, %c0_i32_0 : i32, i32
  }
  func.func @transform_6(%arg0: i32) -> (i32, i32) {
    %c0_i32 = arith.constant 0 : i32
    %c0_i32_0 = arith.constant 0 : i32
    %c0_i32_1 = arith.constant 0 : i32
    return %c0_i32, %c0_i32_0 : i32, i32
  }
  func.func @transform_7(%arg0: i32) -> (i32, i32) {
    %c0_i32 = arith.constant 0 : i32
    %c0_i32_0 = arith.constant 0 : i32
    %c0_i32_1 = arith.constant 0 : i32
    return %c0_i32, %c0_i32_0 : i32, i32
  }
  func.func @transform_8(%arg0: i32) -> (i32, i32) {
    %c0_i32 = arith.constant 0 : i32
    %c0_i32_0 = arith.constant 0 : i32
    %c0_i32_1 = arith.constant 0 : i32
    return %c0_i32, %c0_i32_0 : i32, i32
  }
  func.func @transform_9(%arg0: i32) -> (i32, i32) {
    %c0_i32 = arith.constant 0 : i32
    %c0_i32_0 = arith.constant 0 : i32
    %c0_i32_1 = arith.constant 0 : i32
    return %c0_i32, %c0_i32_0 : i32, i32
  }
  func.func @transform_10(%arg0: i32) -> (i32, i32) {
    %c0_i32 = arith.constant 0 : i32
    %c0_i32_0 = arith.constant 0 : i32
    %c0_i32_1 = arith.constant 0 : i32
    return %c0_i32, %c0_i32_0 : i32, i32
  }
  func.func @transform_11(%arg0: i32) -> (i32, i32) {
    %c0_i32 = arith.constant 0 : i32
    %c0_i32_0 = arith.constant 0 : i32
    return %arg0, %c0_i32 : i32, i32
  }
}

</mosaic_0001>

<bundles_post_ra>
// kernel: tpu_custom_call.1
= control target key start
LH: loop header
LB: loop body
LE: loop exit
PB: predicated region body
PF: predicated region fallthrough
CT: control target
= control target key end

     0   :  { %vm68_vm0 = vcmask 80896   ;;  %v700_v4 = vmov 0   ;;  %s856_s0 = inlined_call_operand.vmem [shape: f32[8,10], index: 0, kind: input, shape index: {}]   ;;  %s857_s1 = inlined_call_operand.vmem [shape: f32[32,10], index: 1, kind: input, shape index: {}]   ;;  %s858_s2 = inlined_call_operand.vmem [shape: f32[32,1], index: 2, kind: input, shape index: {}]   ;;  %s859_s3 = inlined_call_operand.vmem [shape: f32[16,32], index: 3, kind: input, shape index: {}]   ;;  %s860_s4 = inlined_call_operand.vmem [shape: f32[16,1], index: 4, kind: input, shape index: {}]   ;;  %s861_s5 = inlined_call_operand.vmem [shape: f32[4,16], index: 5, kind: input, shape index: {}]   ;;  %s862_s6 = inlined_call_operand.vmem [shape: f32[4,1], index: 6, kind: input, shape index: {}]   ;;  %s863_s7 = inlined_call_operand.vmem [shape: f32[16,4], index: 7, kind: input, shape index: {}]   ;;  %s864_s8 = inlined_call_operand.vmem [shape: f32[16,1], index: 8, kind: input, shape index: {}]   ;;  %s865_s9 = inlined_call_operand.vmem [shape: f32[16,32], index: 9, kind: input, shape index: {}]   ;;  %s866_s10 = inlined_call_operand.vmem [shape: f32[1,32], index: 10, kind: input, shape index: {}]   ;;  %s867_s11 = inlined_call_operand.hbm [shape: f32[8,32], index: 11, kind: output, shape index: {}]  }
   0x1   :  { %v39_v0 = vld [vmem:[%s856_s0] sm:$0xff]  ;;  %v41_v3 = vld [vmem:[%s857_s1 + $0x8] sm:$0xff]  ;;  %674 = vset.pattern.permute.xlu0 %v700_v4  ;;  %v46_v5 = vld [vmem:[%s858_s2 + $0x10] sm:$0xff]  ;;  %675 = vset.pattern.permute.xlu1 %v700_v4 }
   0x2   :  { %v40_v1 = vld [vmem:[%s857_s1] sm:$0xff]  ;;  %617 = vmatprep.subr.msk.mxu0 %vm68_vm0, %v39_v0  ;;  %v42_v6 = vld [vmem:[%s857_s1 + $0x10] sm:$0xff]  ;;  %v45_v7 = vld [vmem:[%s858_s2 + $0x8] sm:$0xff]  ;;  %60 = vperm.xlu1 %675, %v46_v5  }
   0x3   :  { %619 = vmatprep.mubr.msk.f32.mxu0 %vm68_vm0, %v40_v1  ;;  %v44_v2 = vld [vmem:[%s858_s2] sm:$0xff]  ;;  %618 = vmatpush3.xpose.msk.msra.mxu0 %vm68_vm0, %v39_v0 }
   0x4   :  { %50 = vperm.xlu0 %674, %v44_v2  }
   0x5   :  { %16 = vsyncpa [#allocation3], 0  ;;  %v47_v8 = vld [vmem:[%s858_s2 + $0x18] sm:$0xff]  ;;  %v175_v10 = vld [vmem:[%s860_s4] sm:$0xff]  ;;  %vm187_vm1 = vcmask 261120   ;;  %v701_v35 = vmov 0.0|0.0  }
   0x6   :  { %620 = vmatmul.mubr.msk.f32.vlgmr.msra.gmra.mrb[0].mxu0 %vm68_vm0, %v41_v3  ;;  %v43_v9 = vld [vmem:[%s857_s1 + $0x18] sm:$0xff]  ;;  %65 = vperm.xlu1 %675, %v47_v8   ;;  %v176_v11 = vld [vmem:[%s860_s4 + $0x8] sm:$0xff]  ;;  %v272_v12 = vld [vmem:[%s862_s6] sm:$0xf]  ;;  %vm702_vm2 = vmmov 0   ;;  %v703_v36 = vmov 0.0  }
   0x7   :  { %622 = vmatprep.mubr.msk.f32.mxu0 %vm68_vm0, %v42_v6  ;;  %v355_v13 = vld [vmem:[%s864_s8] sm:$0xff]  ;;  %v356_v14 = vld [vmem:[%s864_s8 + $0x8] sm:$0xff]  ;;  %663 = vmatprep.subr.bf16.mxu0 %v701_v35  ;;  %vm278_vm3 = vcmask 130048   ;;  %vm367_vm4 = vcmask 31744   ;;  %vm374_vm5 = vcmask 1043456  }
   0x8   :  { %55 = vperm.xlu0 %674, %v45_v7   ;;  %v173_v15 = vld [vmem:[%s859_s3] sm:$0xff]  ;;  %v174_v34 = vld [vmem:[%s859_s3 + $0x8] sm:$0xff] }
   0x9   :  { %633 = vmatprep.mubr.msk.f32.mxu1 %vm187_vm1, %v173_v15  ;;  %v271_v46 = vld [vmem:[%s861_s5] sm:$0xf]  ;;  %v354_v53 = vld [vmem:[%s863_s7 + $0x8] sm:$0xff] }
   0xa   :  { %623 = vmatmul.mubr.msk.f32.gmra.mrb[2].mxu0 %vm68_vm0, %v43_v9  ;;  %184 = vperm.xlu1 %675, %v176_v11   ;;  %v353_v47 = vld [vmem:[%s863_s7] sm:$0xff]  ;;  %v456_v55 = vld [vmem:[%s865_s9 + $0x8] sm:$0xff] }
   0xb   :  { %640 = vmatprep.mubr.msk.f32.mxu0 %vm702_vm2, %v703_v36  ;;  %v455_v54 = vld [vmem:[%s865_s9] sm:$0xff]  ;;  %s704_s9 = smov [#allocation2]  }
   0xc   :  { %179 = vperm.xlu0 %674, %v175_v10   ;;  %v667_v56 = vpack.c.bf16 %v456_v55, %v455_v54  ;;  %v595_v2 = vld [vmem:[%s866_s10] ss:$0 sm:$0xff]  ;;  %s576_s13 = sshll.u32 %s704_s9, 4  ;;  %s577_s13 = int_to_ptr.vmem [resolvable:$true] %s576_s13 }
   0xd   :  { %s676_s14 = scalar_lea.vmem %s577_s13, 128  ;;  %p681_p1 = scmp.lt.s32.totalorder %s577_s13, %s577_s13 }
   0xe   :  { %359 = vperm.xlu1 %675, %v355_v13   ;;  %p677_p0 = scmp.ne.s32.totalorder %s577_s13, %s676_s14  ;;  %p682_p2 = scmp.lt.s32.totalorder %s676_s14, %s676_s14 }
  0x10   :  { %275 = vperm.xlu0 %674, %v272_v12   ;;  %p683_p3 = por %p682_p2, %p681_p1 }
  0x12   :  { %p684_p4 = pnand %p683_p3, %p677_p0 }
  0x14   :  { %364 = vperm.xlu0 %674, %v356_v14  }
  0x81   :  { %v61_v17 = vpop.permute.xlu1 %60 }
  0x83   :  { %v51_v16 = vpop.permute.xlu0 %50 }
  0x85   :  { %v66_v24 = vpop.permute.xlu1 %65 }
  0x87   :  { %v56_v18 = vpop.permute.xlu0 %55 }
  0x89   :  { %v185_v37 = vpop.permute.xlu1 %184 }
  0x8b   :  { %v180_v39 = vpop.permute.xlu0 %179 }
  0x8d   :  { %v360_v58 = vpop.permute.xlu1 %359 }
  0x8f   :  { %v276_v48 = vpop.permute.xlu0 %275 }
  0x93   :  { %v365_v61 = vpop.permute.xlu0 %364 }
  0xd9   :  { %v621_v19 = vpop.f32.mrb[0].mxu0 }
  0xda   :  { %v156_v20 = vadd.f32 %v621_v19, %v56_v18  ;;  %v150_v21 = vpop.f32.mrb[1].mxu0 }
  0xdb   :  { %v151_v22 = vadd.f32 %v150_v21, %v51_v16 }
  0xdc   :  { %v170_v23 = vmax.f32 %v156_v20, 0.0 }
  0xdd   :  { %v169_v25 = vmax.f32 %v151_v22, 0.0  ;;  %v624_v26 = vpop.f32.mrb[2].mxu0 }
  0xde   :  { %v166_v27 = vadd.f32 %v624_v26, %v66_v24  ;;  %v160_v28 = vpop.f32.mrb[3].mxu0 }
  0xdf   :  { %v161_v29 = vadd.f32 %v160_v28, %v61_v17  ;;  %v655_v30 = vpack.c.bf16 %v170_v23, %v169_v25 }
  0xe0   :  { %v172_v31 = vmax.f32 %v166_v27, 0.0 }
  0xe1   :  { %v171_v32 = vmax.f32 %v161_v29, 0.0  ;;  %656 = vmatprep.subr.bf16.mxu1 %v655_v30 }
  0xe2   :  { %658 = vmatpush3.bf16.msra.mxu1 %v655_v30 }
  0xe3   :  { %v659_v33 = vpack.c.bf16 %v172_v31, %v171_v32 }
  0xe5   :  { %660 = vmatprep.subr.bf16.mxu1 %v659_v33 }
  0xe6   :  { %662 = vmatpush3.bf16.msra.mxu1 %v659_v33 }
  0xe9   :  { %634 = vmatmul.mubr.msk.f32.vlgmr.msra.gmra.mrb[0].mxu1 %vm187_vm1, %v174_v34 }
  0xea   :  { %645 = vmatprep.mubr.msk.f32.mxu1 %vm367_vm4, %v353_v47 }
 0x1bc   :  { %v635_v38 = vpop.f32.mrb[0].mxu1 }
 0x1bd   :  { %v266_v40 = vadd.f32 %v635_v38, %v185_v37  ;;  %v260_v41 = vpop.f32.mrb[1].mxu1 }
 0x1be   :  { %v261_v42 = vadd.f32 %v260_v41, %v180_v39 }
 0x1bf   :  { %v270_v43 = vmax.f32 %v266_v40, 0.0 }
 0x1c0   :  { %v269_v44 = vmax.f32 %v261_v42, 0.0 }
 0x1c2   :  { %v664_v45 = vpack.c.bf16 %v270_v43, %v269_v44 }
 0x1c4   :  { %665 = vmatpush3.bf16.msra.mxu0 %v664_v45 }
 0x1c5   :  { %666 = vmatprep.subr.bf16.mxu0 %v701_v35 }
 0x1c7   :  { %641 = vmatmul.mubr.msk.f32.vlgmr.msra.gmra.mrb[4].mxu0 %vm278_vm3, %v271_v46 }
 0x1c8   :  { %652 = vmatprep.mubr.msk.f32.mxu0 %vm702_vm2, %v703_v36  ;;  %668 = vmatpush3.bf16.msra.mxu0 %v667_v56 }
 0x29a   :  { %v348_v49 = vpop.f32.mrb[4].mxu0 }
 0x29b   :  { %v349_v50 = vadd.f32 %v348_v49, %v276_v48  ;;  %v642_v51 = vpop.f32.mrb[5].mxu0 }
 0x29d   :  { %v352_v52 = vmax.f32 %v349_v50, 0.0 }
 0x29f   :  { %643 = vmatprep.subr.msk.mxu1 %vm374_vm5, %v352_v52 }
 0x2a0   :  { %644 = vmatpush3.msk.msra.mxu1 %vm374_vm5, %v352_v52 }
 0x2a1   :  { %646 = vmatmul.mubr.msk.f32.vlgmr.msra.gmra.mrb[2].mxu1 %vm367_vm4, %v354_v53 }
 0x374   :  { %v647_v57 = vpop.f32.mrb[2].mxu1 }
 0x375   :  { %v444_v59 = vpop.f32.mrb[3].mxu1  ;;  %v450_v62 = vadd.f32 %v647_v57, %v365_v61 }
 0x376   :  { %v445_v60 = vadd.f32 %v444_v59, %v360_v58 }
 0x377   :  { %v454_v0 = vmax.f32 %v450_v62, 0.0 }
 0x378   :  { %v453_v63 = vmax.f32 %v445_v60, 0.0 }
 0x37a   :  { %464 = vxpose.xlu1.b32.start [1/2] (short) (narrow) %v453_v63, 8 }
 0x37e   :  { %465 = vxpose.xlu1.b32.end [2/2] (short) (narrow) %v454_v0, 8 }
 0x3fa   :  { %v480_v1 = vpop.trf.xlu1 }
 0x3fb   :  { %653 = vmatmul.mubr.msk.f32.vlgmr.msra.gmra.mrb[6].mxu0 %vm278_vm3, %v480_v1 }
 0x4ce   :  { %v565_v3 = vpop.f32.mrb[6].mxu0 }
 0x4cf   :  { %v566_v4 = vadd.f32 %v595_v2, %v565_v3  ;;  %v654_v5 = vpop.f32.mrb[7].mxu0 }
 0x4d1   :  { %569 = vst.msk [vmem:[#allocation2] sm:$0xff] %vm187_vm1, %v566_v4 }
 0x4d2   :  { %687 = shalt.err (!%p684_p4)
}
 0x4d3   :  { %s688_s17 = scalar_lea.hbm %s867_s11, 128 }
 0x4d4   :  { %p689_p5 = scmp.ne.s32.totalorder %s867_s11, %s688_s17  ;;  %p692_p6 = scmp.lt.u32.totalorder %s688_s17, %s867_s11 }
 0x4d6   :  { %p694_p7 = pnand %p692_p6, %p689_p5 }
 0x4d8   :  { %697 = shalt.err (!%p694_p7)
}
 0x4d9   :  { %579 = dma.vmem_to_hbm [thread:$0]  %s577_s13, 128, %s867_s11, [#allocation3]  }
 0x4da   :  { %698 = dma.done.wait [#allocation3], 128  }
 0x4db   :  { %699 = vsyncadd [#allocation3], 4294967168 }
 0x4dc   :  { %583 = vsyncpa [#allocation3], 1 }

</bundles_post_ra>
